<compile_context>
chip_gen: v7x
topology: tpu7x:2x2x1
jax: 0.10.0
libtpu: 0.0.40
codegen_flags: <defaults>
</compile_context>

<pallas_src>
import math

import jax
import jax.numpy as jnp
from jax.experimental import pallas as pl
from jax.experimental.pallas import tpu as pltpu


# ---------------------------------------------------------------------------
# VMEM budgeting (generation-aware)
# ---------------------------------------------------------------------------
def _vmem_limit_bytes() -> int:
    cap = 64 * 1024 * 1024
    try:
        info = pltpu.get_tpu_info()
        cap = int(getattr(info, "vmem_capacity_bytes", cap))
    except Exception:
        pass
    # ~75% of physical: ~96 MiB on v5e/v6e (128 MiB), ~48 MiB on v7x (64 MiB).
    return int(cap * 0.75)


def _choose_tiles(n: int, k: int, p: int, d: int,
                  in_bytes: int, out_bytes: int, budget: int):
    """Pick (G = images per grid step, tD = output-channel tile)."""
    # --- output-channel tile: keep full D resident unless it is huge. -----
    t_d = d
    if d % 128 == 0:
        for cand in (d, 2048, 1024, 512, 256, 128):
            if cand <= d and d % cand == 0 and 2 * k * cand * in_bytes <= budget // 3:
                t_d = cand
                break
        else:
            t_d = 128
    # --- images per grid step (double-buffered footprint must fit). -------
    def footprint(g):
        return (2 * g * k * p * in_bytes        # patch columns
                + 2 * g * t_d * p * out_bytes   # output tile
                + 2 * k * t_d * in_bytes        # weight tile (resident)
                + 2 * t_d * 4)                  # bias
    g = min(n, 32)                               # cap static unroll length
    while g > 1 and footprint(g) > budget:
        g -= 1
    return g, t_d


# ---------------------------------------------------------------------------
# Pallas GEMM:  out[n, :, :] = W_flat @ patch_cols[n] + b   (channel-major)
# ---------------------------------------------------------------------------
def _patchify_gemm(patches, w_flat, bias_col, out_dtype):
    """patches (N, K, P)  x  w_flat (D, K)  + bias (D, 1)  ->  (N, D, P)."""
    n, k, p = patches.shape
    d = w_flat.shape[0]
    in_bytes = patches.dtype.itemsize
    out_bytes = jnp.dtype(out_dtype).itemsize

    vmem_limit = _vmem_limit_bytes()
    g, t_d = _choose_tiles(n, k, p, d, in_bytes, out_bytes,
                           budget=int(vmem_limit * 0.7))

    def kernel(p_ref, w_ref, b_ref, o_ref):
        # p_ref: (G, K, P)   patch columns for G images
        # w_ref: (tD, K)     flattened conv weight tile (resident over images)
        # b_ref: (tD, 1)     bias tile (f32)
        # o_ref: (G, tD, P)  channel-major output tile
        w = w_ref[...]
        b = b_ref[...]
        for gg in range(g):  # static unroll, g <= 32
            acc = jnp.dot(w, p_ref[gg], preferred_element_type=jnp.float32)
            o_ref[gg] = (acc + b).astype(o_ref.dtype)

    grid = (pl.cdiv(n, g), d // t_d)
    out = pl.pallas_call(
        kernel,
        out_shape=jax.ShapeDtypeStruct((n, d, p), out_dtype),
        grid=grid,
        in_specs=[
            # image groups stream; constant over the inner D axis -> fetched once
            pl.BlockSpec((g, k, p), lambda i, j: (i, 0, 0)),
            # weight / bias tiles, resident over the image axis
            pl.BlockSpec((t_d, k), lambda i, j: (j, 0)),
            pl.BlockSpec((t_d, 1), lambda i, j: (j, 0)),
        ],
        out_specs=pl.BlockSpec((g, t_d, p), lambda i, j: (i, j, 0)),
        compiler_params=pltpu.CompilerParams(
            dimension_semantics=("parallel", "parallel"),
            vmem_limit_bytes=vmem_limit,
        ),
    )(patches, w_flat, bias_col)
    return out


# ---------------------------------------------------------------------------
# Module-equivalent wrapper
# ---------------------------------------------------------------------------
class Patchify:
    """JAX/Pallas equivalent of the PyTorch Patchify module (Conv2d patch embed)."""

    def __init__(self, im_h, im_w, patch_h, patch_w, dim, *, key,
                 compute_dtype=jnp.bfloat16, out_dtype=None):
        assert im_h % patch_h == 0, "Image and patch heights must be divisible."
        assert im_w % patch_w == 0, "Image and patch widths must be divisible."
        self.im_h, self.im_w = im_h, im_w
        self.patch_h, self.patch_w = patch_h, patch_w
        self.dim = dim
        self.compute_dtype = compute_dtype
        self.out_dtype = out_dtype

        in_ch = 3
        fan_in = in_ch * patch_h * patch_w
        bound = 1.0 / math.sqrt(fan_in)
        k_w, k_b = jax.random.split(key)
        # PyTorch-conv-style params: weight (out_ch, in_ch, kh, kw), bias (out_ch,)
        self.weight = jax.random.uniform(
            k_w, (dim, in_ch, patch_h, patch_w),
            minval=-bound, maxval=bound, dtype=jnp.float32)
        self.bias = jax.random.uniform(
            k_b, (dim,), minval=-bound, maxval=bound, dtype=jnp.float32)

        # GEMM operands, built once.  k-order is (c, i, j) — matches the patch
        # column layout produced in _forward_impl.  No zero-padding.
        k_dim = in_ch * patch_h * patch_w
        self._w_flat = self.weight.reshape(dim, k_dim).astype(compute_dtype)
        self._bias_col = self.bias.reshape(dim, 1)  # f32

        # jit the whole forward: patch extraction + cast become one XLA fusion
        # feeding the Pallas kernel; the final NCHW view is a free reshape.
        self._forward = jax.jit(self._forward_impl)

    def _forward_impl(self, x):
        n, c, h, w = x.shape
        assert c == 3, "Patchify projects from 3 input channels."
        ph, pw = self.patch_h, self.patch_w
        nh, nw = h // ph, w // pw
        p_cnt = nh * nw
        k_dim = c * ph * pw

        # (N, C, H, W) -> patch columns (N, K, P), k-order (c, i, j).
        patches = x.reshape(n, c, nh, ph, nw, pw)
        patches = patches.transpose(0, 1, 3, 5, 2, 4).reshape(n, k_dim, p_cnt)
        patches = patches.astype(self.compute_dtype)

        out_dtype = self.out_dtype if self.out_dtype is not None else x.dtype
        out = _patchify_gemm(patches, self._w_flat, self._bias_col, out_dtype)
        # (N, dim, nh*nw) -> (N, dim, nh, nw): pure reshape, no data movement.
        return out.reshape(n, self.dim, nh, nw)

    def __call__(self, x):
        return self._forward(x)


# ---------------------------------------------------------------------------
# Main
# ---------------------------------------------------------------------------
if __name__ == "__main__":
    key = jax.random.PRNGKey(0)
    k_param, k_x = jax.random.split(key)

    # Small shapes consistent with the module's forward (in_ch fixed to 3).
    batch, in_ch = 2, 3
    im_h = im_w = 16
    patch_h = patch_w = 4
    dim = 32

    model = Patchify(im_h, im_w, patch_h, patch_w, dim, key=k_param)
    x = jax.random.normal(k_x, (batch, in_ch, im_h, im_w), dtype=jnp.float32)

    out = jax.block_until_ready(model(x))

    # Reference: strided conv via lax (same semantics as nn.Conv2d), f32.
    ref = jax.lax.conv_general_dilated(
        x, model.weight,
        window_strides=(patch_h, patch_w),
        padding="VALID",
        dimension_numbers=("NCHW", "OIHW", "NCHW"),
    ) + model.bias.reshape(1, dim, 1, 1)
    ref = jax.block_until_ready(ref)

    assert out.shape == (batch, dim, im_h // patch_h, im_w // patch_w), out.shape
    # bf16 operands with f32 accumulation -> loosened tolerance vs f32 reference.
    max_err = float(jnp.max(jnp.abs(out.astype(jnp.float32) - ref)))
    assert jnp.allclose(out.astype(jnp.float32), ref, atol=5e-2, rtol=5e-2), max_err

    print("KERNEL_OK")
</pallas_src>

<mosaic_0001>
module attributes {stable_mosaic.version = 11 : i64} {
  func.func @kernel(%arg0: i32, %arg1: i32, %arg2: memref<2x48x16xbf16, #tpu.memory_space<vmem>>, %arg3: memref<32x48xbf16, #tpu.memory_space<vmem>>, %arg4: memref<32x1xf32, #tpu.memory_space<vmem>>, %arg5: memref<2x32x16xf32, #tpu.memory_space<vmem>>) attributes {dimension_semantics = [#tpu.dimension_semantics<parallel>, #tpu.dimension_semantics<parallel>], iteration_bounds = array<i64: 1, 1>, scalar_prefetch = 0 : i64, scratch_operands = 0 : i64, tpu.core_type = #tpu.core_type<tc>, window_params = [{transform_indices = @transform_0, window_bounds = array<i64: 2, 48, 16>}, {transform_indices = @transform_1, window_bounds = array<i64: 32, 48>}, {transform_indices = @transform_2, window_bounds = array<i64: 32, 1>}, {transform_indices = @transform_3, window_bounds = array<i64: 2, 32, 16>}]} {
    %c0 = arith.constant 0 : index
    %c0_0 = arith.constant 0 : index
    %0 = vector.load %arg3[%c0, %c0_0] : memref<32x48xbf16, #tpu.memory_space<vmem>>, vector<32x48xbf16>
    %c0_1 = arith.constant 0 : index
    %c0_2 = arith.constant 0 : index
    %1 = vector.load %arg4[%c0_1, %c0_2] : memref<32x1xf32, #tpu.memory_space<vmem>>, vector<32x1xf32>
    %c0_3 = arith.constant 0 : index
    %c0_4 = arith.constant 0 : index
    %c0_5 = arith.constant 0 : index
    %2 = vector.load %arg2[%c0_3, %c0_4, %c0_5] : memref<2x48x16xbf16, #tpu.memory_space<vmem>>, vector<1x48x16xbf16>
    %3 = vector.shape_cast %2 : vector<1x48x16xbf16> to vector<48x16xbf16>
    %cst = arith.constant dense<0.000000e+00> : vector<32x16xf32>
    %4 = tpu.matmul %0, %3, %cst {dimension_numbers = #tpu.dot_dimension_numbers<[1], [0], [0], [1], [0, 0, 1, 1], [], []>} : vector<32x48xbf16>, vector<48x16xbf16>, vector<32x16xf32> -> vector<32x16xf32>
    %5 = vector.broadcast %1 : vector<32x1xf32> to vector<32x16xf32>
    %6 = arith.addf %4, %5 : vector<32x16xf32>
    %c0_6 = arith.constant 0 : index
    %c0_7 = arith.constant 0 : index
    %c0_8 = arith.constant 0 : index
    %7 = vector.load %arg5[%c0_6, %c0_7, %c0_8] : memref<2x32x16xf32, #tpu.memory_space<vmem>>, vector<1x32x16xf32>
    %8 = vector.shape_cast %7 : vector<1x32x16xf32> to vector<32x16xf32>
    %9 = vector.shape_cast %6 : vector<32x16xf32> to vector<1x32x16xf32>
    tpu.vector_store %arg5[%c0_6, %c0_7, %c0_8], %9 {strides = array<i32>} : memref<2x32x16xf32, #tpu.memory_space<vmem>>, vector<1x32x16xf32>,
    %c1 = arith.constant 1 : index
    %c0_9 = arith.constant 0 : index
    %c0_10 = arith.constant 0 : index
    %10 = vector.load %arg2[%c1, %c0_9, %c0_10] : memref<2x48x16xbf16, #tpu.memory_space<vmem>>, vector<1x48x16xbf16>
    %11 = vector.shape_cast %10 : vector<1x48x16xbf16> to vector<48x16xbf16>
    %cst_11 = arith.constant dense<0.000000e+00> : vector<32x16xf32>
    %12 = tpu.matmul %0, %11, %cst_11 {dimension_numbers = #tpu.dot_dimension_numbers<[1], [0], [0], [1], [0, 0, 1, 1], [], []>} : vector<32x48xbf16>, vector<48x16xbf16>, vector<32x16xf32> -> vector<32x16xf32>
    %13 = vector.broadcast %1 : vector<32x1xf32> to vector<32x16xf32>
    %14 = arith.addf %12, %13 : vector<32x16xf32>
    %c1_12 = arith.constant 1 : index
    %c0_13 = arith.constant 0 : index
    %c0_14 = arith.constant 0 : index
    %15 = vector.load %arg5[%c1_12, %c0_13, %c0_14] : memref<2x32x16xf32, #tpu.memory_space<vmem>>, vector<1x32x16xf32>
    %16 = vector.shape_cast %15 : vector<1x32x16xf32> to vector<32x16xf32>
    %17 = vector.shape_cast %14 : vector<32x16xf32> to vector<1x32x16xf32>
    tpu.vector_store %arg5[%c1_12, %c0_13, %c0_14], %17 {strides = array<i32>} : memref<2x32x16xf32, #tpu.memory_space<vmem>>, vector<1x32x16xf32>,
    return
  }
  func.func @transform_0(%arg0: i32, %arg1: i32) -> (i32, i32, i32) {
    %c0_i32 = arith.constant 0 : i32
    %c0_i32_0 = arith.constant 0 : i32
    %c0_i32_1 = arith.constant 0 : i32
    return %arg0, %c0_i32, %c0_i32_0 : i32, i32, i32
  }
  func.func @transform_1(%arg0: i32, %arg1: i32) -> (i32, i32) {
    %c0_i32 = arith.constant 0 : i32
    %c0_i32_0 = arith.constant 0 : i32
    return %arg1, %c0_i32 : i32, i32
  }
  func.func @transform_2(%arg0: i32, %arg1: i32) -> (i32, i32) {
    %c0_i32 = arith.constant 0 : i32
    %c0_i32_0 = arith.constant 0 : i32
    return %arg1, %c0_i32 : i32, i32
  }
  func.func @transform_3(%arg0: i32, %arg1: i32) -> (i32, i32, i32) {
    %c0_i32 = arith.constant 0 : i32
    %c0_i32_0 = arith.constant 0 : i32
    return %arg0, %arg1, %c0_i32 : i32, i32, i32
  }
}

</mosaic_0001>

<bundles_post_ra>
// kernel: _forward_impl.1
= control target key start
LH: loop header
LB: loop body
LE: loop exit
PB: predicated region body
PF: predicated region fallthrough
CT: control target
= control target key end

     0   :  { %v284_v1 = vmov 0   ;;  %vm77_vm0 = vcmask 392192   ;;  %vm133_vm1 = vcmask 130048   ;;  %s377_s0 = inlined_call_operand.vmem [shape: bf16[2,48,16], index: 0, kind: input, shape index: {}]   ;;  %s378_s1 = inlined_call_operand.vmem [shape: bf16[32,48], index: 1, kind: input, shape index: {}]   ;;  %s379_s2 = inlined_call_operand.vmem [shape: f32[32,1], index: 2, kind: input, shape index: {}]   ;;  %s380_s3 = inlined_call_operand.vmem [shape: f32[2,32,16], index: 3, kind: output, shape index: {}]  }
   0x1   :  { %v276_v0 = vld [vmem:[%s377_s0] sm:$0xff]   ;;  %275 = vset.pattern.permute.xlu1 %v284_v1  ;;  %274 = vset.pattern.permute.xlu0 %v284_v1  ;;  %v277_v2 = vld [vmem:[%s377_s0 + $0x18] sm:$0xff]   ;;  %v278_v3 = vld [vmem:[%s377_s0 + $0x8] sm:$0xff]  }
   0x2   :  { %253 = vmatprep.subr.bf16.mxu0 %v276_v0  ;;  %263 = vmatprep.subr.bf16.mxu1 %v277_v2  ;;  %v279_v4 = vld [vmem:[%s377_s0 + $0x20] sm:$0xff]   ;;  %v280_v5 = vld [vmem:[%s377_s0 + $0x10] sm:$0xff]   ;;  %v281_v6 = vld [vmem:[%s377_s0 + $0x28] sm:$0xff]  }
   0x3   :  { %254 = vmatpush3.bf16.msra.mxu0 %v276_v0  ;;  %264 = vmatpush3.bf16.msra.mxu1 %v277_v2  ;;  %v282_v7 = vld [vmem:[%s378_s1] sm:$0xff]   ;;  %v21_v8 = vld [vmem:[%s379_s2 + $0x10] sm:$0xff]  ;;  %v283_v10 = vld [vmem:[%s378_s1 + $0x8] sm:$0xff]  }
   0x4   :  { %255 = vmatprep.subr.bf16.mxu0 %v278_v3  ;;  %265 = vmatprep.subr.bf16.mxu1 %v279_v4  ;;  %v19_v9 = vld [vmem:[%s379_s2] sm:$0xff]  ;;  %v22_v11 = vld [vmem:[%s379_s2 + $0x18] sm:$0xff]  ;;  %v20_v12 = vld [vmem:[%s379_s2 + $0x8] sm:$0xff] }
   0x5   :  { %259 = vmatprep.mubr.msk.bf16.mxu0 %vm77_vm0, %v282_v7  ;;  %269 = vmatprep.mubr.msk.bf16.mxu1 %vm77_vm0, %v282_v7 }
   0x6   :  { %41 = vperm.xlu1 %275, %v21_v8   ;;  %31 = vperm.xlu0 %274, %v19_v9  }
   0x7   :  { %256 = vmatpush3.bf16.msra.mxu0 %v278_v3  ;;  %266 = vmatpush3.bf16.msra.mxu1 %v279_v4 }
   0x8   :  { %257 = vmatprep.subr.bf16.mxu0 %v280_v5  ;;  %267 = vmatprep.subr.bf16.mxu1 %v281_v6 }
   0xa   :  { %46 = vperm.xlu1 %275, %v22_v11   ;;  %36 = vperm.xlu0 %274, %v20_v12  }
   0xb   :  { %258 = vmatpush3.bf16.msra.mxu0 %v280_v5  ;;  %268 = vmatpush3.bf16.msra.mxu1 %v281_v6 }
   0xe   :  { %260 = vmatmul.mubr.msk.bf16.vlgmr.msra.gmra.mrb[0].mxu0 %vm77_vm0, %v283_v10  ;;  %270 = vmatmul.mubr.msk.bf16.vlgmr.msra.gmra.mrb[0].mxu1 %vm77_vm0, %v283_v10 }
  0x85   :  { %v42_v13 = vpop.permute.xlu1 %41  ;;  %v32_v14 = vpop.permute.xlu0 %31 }
  0x89   :  { %v47_v15 = vpop.permute.xlu1 %46  ;;  %v37_v16 = vpop.permute.xlu0 %36 }
  0xe1   :  { %v261_v17 = vpop.f32.mrb[0].mxu0  ;;  %v271_v19 = vpop.f32.mrb[0].mxu1 }
  0xe2   :  { %v127_v18 = vadd.f32 %v261_v17, %v42_v13  ;;  %v118_v20 = vpop.f32.mrb[1].mxu0  ;;  %v206_v21 = vadd.f32 %v271_v19, %v42_v13  ;;  %v197_v23 = vpop.f32.mrb[1].mxu1 }
  0xe3   :  { %v119_v22 = vadd.f32 %v118_v20, %v32_v14  ;;  %v262_v24 = vpop.f32.mrb[2].mxu0  ;;  %v198_v25 = vadd.f32 %v197_v23, %v32_v14  ;;  %v272_v27 = vpop.f32.mrb[2].mxu1 }
  0xe4   :  { %136 = vst.msk [vmem:[%s380_s3 + $0x10] sm:$0xff] %vm133_vm1, %v127_v18  ;;  %v130_v26 = vadd.f32 %v262_v24, %v47_v15  ;;  %v121_v28 = vpop.f32.mrb[3].mxu0  ;;  %241 = vst.msk [vmem:[%s380_s3 + $0x30] sm:$0xff] %vm133_vm1, %v206_v21  ;;  %v209_v29 = vadd.f32 %v272_v27, %v47_v15  ;;  %v200_v31 = vpop.f32.mrb[3].mxu1 }
  0xe5   :  { %134 = vst.msk [vmem:[%s380_s3] sm:$0xff] %vm133_vm1, %v119_v22  ;;  %v122_v30 = vadd.f32 %v121_v28, %v37_v16  ;;  %239 = vst.msk [vmem:[%s380_s3 + $0x20] sm:$0xff] %vm133_vm1, %v198_v25  ;;  %v201_v32 = vadd.f32 %v200_v31, %v37_v16 }
  0xe6   :  { %137 = vst.msk [vmem:[%s380_s3 + $0x18] sm:$0xff] %vm133_vm1, %v130_v26  ;;  %242 = vst.msk [vmem:[%s380_s3 + $0x38] sm:$0xff] %vm133_vm1, %v209_v29 }
  0xe7   :  { %135 = vst.msk [vmem:[%s380_s3 + $0x8] sm:$0xff] %vm133_vm1, %v122_v30  ;;  %240 = vst.msk [vmem:[%s380_s3 + $0x28] sm:$0xff] %vm133_vm1, %v201_v32 }

</bundles_post_ra>
